<compile_context>
chip_gen: v7x
topology: tpu7x:2x2x1
jax: 0.10.0
libtpu: 0.0.40
codegen_flags: <defaults>
</compile_context>

<pallas_src>
import functools

import jax
import jax.numpy as jnp
import numpy as np
from jax.experimental import pallas as pl
from jax.experimental.pallas import tpu as pltpu

BN_EPS = 1e-5
VMEM_LIMIT = 32 * 1024 * 1024
_ROW_OFF = 7  # physical scratch row of "padded row 0"; the image starts at row 8
              # so the per-batch scratch fill is a sublane-aligned store.


# ---------------------------------------------------------------------------
# Kernel 1: per-channel sum / sum-of-squares reduction (BN1 batch statistics on x).
# Input is lane-flattened (N, H, W*C); reduction over N (grid) and H (in-kernel).
# The tiny W-fold + rsqrt epilogue happens in the wrapper on (W*C,) vectors.
# (BN2 statistics do NOT use this kernel: they are produced by the conv1 kernel.)
# ---------------------------------------------------------------------------
def _bn_stats_kernel(x_ref, sum_ref, sq_ref, s_acc, q_acc):
    @pl.when(pl.program_id(0) == 0)
    def _():
        s_acc[...] = jnp.zeros_like(s_acc)
        q_acc[...] = jnp.zeros_like(q_acc)

    x = x_ref[...].astype(jnp.float32)                       # (H, W*C)
    s_acc[...] += jnp.sum(x, axis=0, keepdims=True)
    q_acc[...] += jnp.sum(x * x, axis=0, keepdims=True)

    @pl.when(pl.program_id(0) == pl.num_programs(0) - 1)
    def _():
        sum_ref[...] = s_acc[...]
        sq_ref[...] = q_acc[...]


def _bn_stats(x2):
    n, h, wc = x2.shape
    return pl.pallas_call(
        _bn_stats_kernel,
        grid=(n,),
        in_specs=[pl.BlockSpec((None, h, wc), lambda i: (i, 0, 0))],
        out_specs=(pl.BlockSpec((1, wc), lambda i: (0, 0)),
                   pl.BlockSpec((1, wc), lambda i: (0, 0))),
        out_shape=(jax.ShapeDtypeStruct((1, wc), jnp.float32),
                   jax.ShapeDtypeStruct((1, wc), jnp.float32)),
        scratch_shapes=[pltpu.VMEM((1, wc), jnp.float32),
                        pltpu.VMEM((1, wc), jnp.float32)],
        compiler_params=pltpu.CompilerParams(
            dimension_semantics=("arbitrary",),
            vmem_limit_bytes=VMEM_LIMIT),
    )(x2)


def _scale_shift_from_sums(s, q, wsp, c, gamma, beta, count):
    """Turn per-(w,channel) sums into (scale, shift) vectors so that
    relu(BN(x)) == relu(x*scale + shift), tiled to (1, wsp*c) to match the
    lane-flattened activation layout.  Tiny glue on (W*C,) vectors."""
    s = s.reshape(wsp, c).sum(axis=0)
    q = q.reshape(wsp, c).sum(axis=0)
    mean = s / count
    var = q / count - mean * mean                            # biased batch variance
    inv = jax.lax.rsqrt(var + BN_EPS)
    scale = gamma.astype(jnp.float32) * inv
    shift = beta.astype(jnp.float32) - mean * scale
    scale_t = jnp.tile(scale, wsp).reshape(1, wsp * c)
    shift_t = jnp.tile(shift, wsp).reshape(1, wsp * c)
    return scale_t, shift_t


def bn_scale_shift(x2, wsp, c, gamma, beta, count):
    s, q = _bn_stats(x2)
    return _scale_shift_from_sums(s.reshape(-1), q.reshape(-1), wsp, c,
                                  gamma, beta, count)


# ---------------------------------------------------------------------------
# Wrapper-side (glue) construction of banded / Toeplitz weights.  These absorb the
# three dx taps and the W-direction zero padding into one (W*Cin, Wo*Cout) matrix
# per kernel row dy, so each H-tile needs only 3 lane-dense MXU matmuls.
# ---------------------------------------------------------------------------
def make_conv3x3_band(w, wdt, stride):
    """w: (3, 3, Cin, Cout) HWIO  ->  (3, wdt*Cin, Wo*Cout)."""
    kh, kw, cin, cout = w.shape
    wo = (wdt - 1) // stride + 1
    sel = np.zeros((kw, wdt, wo), np.float32)
    for dx in range(kw):
        for ow in range(wo):
            col = ow * stride + dx - 1
            if 0 <= col < wdt:
                sel[dx, col, ow] = 1.0
    band = jnp.einsum("xwv,yxio->ywivo", jnp.asarray(sel), w.astype(jnp.float32),
                      precision=jax.lax.Precision.HIGHEST)
    return band.reshape(kh, wdt * cin, wo * cout)


def make_conv1x1_band(w, wdt, stride):
    """w: (Cin, Cout)  ->  (wdt*Cin, Wo*Cout): strided 1x1 conv as one matmul."""
    cin, cout = w.shape
    wo = (wdt - 1) // stride + 1
    sel = np.zeros((wdt, wo), np.float32)
    for ow in range(wo):
        sel[ow * stride, ow] = 1.0
    band = jnp.einsum("wv,io->wivo", jnp.asarray(sel), w.astype(jnp.float32),
                      precision=jax.lax.Precision.HIGHEST)
    return band.reshape(wdt * cin, wo * cout)


# ---------------------------------------------------------------------------
# Kernel 2: fused  BN(scale/shift) -> ReLU -> 3x3 conv  (+ optional fused shortcut,
# + optional fused per-batch sum / sumsq of the conv output for the *next* BN).
# Grid = (batch, H-tile).  Scratch holds the padded BN'd image for the current batch.
# ---------------------------------------------------------------------------
def _conv3x3_kernel(*refs, stride, tho, h_in, shortcut_mode, sc_stride, emit_stats):
    it = iter(refs)
    x_ref, scale_ref, shift_ref, band_ref = next(it), next(it), next(it), next(it)
    if shortcut_mode == "proj":
        sx_ref, sscale_ref, sshift_ref, sband_ref = (next(it), next(it),
                                                     next(it), next(it))
    elif shortcut_mode == "identity":
        sx_ref = next(it)
    o_ref = next(it)
    if emit_stats:
        sum_ref, sq_ref = next(it), next(it)
    xp_ref = next(it)

    j = pl.program_id(1)

    # Build the BN+ReLU'd, H-zero-padded image once per batch (first H-tile),
    # and reset the per-batch stats accumulators (output-resident across H-tiles).
    @pl.when(j == 0)
    def _():
        x = x_ref[...].astype(jnp.float32)                    # (H, W*Cin)
        y = jnp.maximum(x * scale_ref[...] + shift_ref[...], 0.0)
        xp_ref[...] = jnp.zeros_like(xp_ref)
        xp_ref[_ROW_OFF + 1:_ROW_OFF + 1 + h_in, :] = y       # sublane-aligned store
        if emit_stats:
            sum_ref[...] = jnp.zeros_like(sum_ref)
            sq_ref[...] = jnp.zeros_like(sq_ref)

    lanes_out = o_ref.shape[-1]
    span = (tho - 1) * stride + 1
    row0 = j * (tho * stride)
    if (tho * stride) % 8 == 0:
        row0 = pl.multiple_of(row0, tho * stride)             # aligned-slice hint

    acc = jnp.zeros((tho, lanes_out), jnp.float32)
    for dy in range(3):                                       # 3 banded MXU matmuls
        rows = xp_ref[pl.ds(row0 + dy + _ROW_OFF, span), :]   # (span, W*Cin)
        if stride != 1:
            rows = jax.lax.slice(rows, (0, 0), (span, rows.shape[1]), (stride, 1))
        acc = acc + jnp.dot(rows, band_ref[dy],
                            preferred_element_type=jnp.float32)

    if emit_stats:
        # Per-batch partial stats of the conv output (feeds the next BatchNorm);
        # accumulated directly into the output refs, which stay VMEM-resident
        # across the H-tile axis (their block index only depends on the batch).
        sum_ref[...] += jnp.sum(acc, axis=0, keepdims=True)
        sq_ref[...] += jnp.sum(acc * acc, axis=0, keepdims=True)

    if shortcut_mode == "proj":
        # Fused shortcut: relu(bn1(x)) -> strided 1x1 projection -> add.
        sx = sx_ref[...].astype(jnp.float32)                  # (tho*sc_stride, W*Cin_x)
        if sc_stride != 1:
            sspan = (tho - 1) * sc_stride + 1
            sx = jax.lax.slice(sx, (0, 0), (sspan, sx.shape[1]), (sc_stride, 1))
        sy = jnp.maximum(sx * sscale_ref[...] + sshift_ref[...], 0.0)
        acc = acc + jnp.dot(sy, sband_ref[...],
                            preferred_element_type=jnp.float32)
    elif shortcut_mode == "identity":
        acc = acc + sx_ref[...].astype(jnp.float32)           # add x itself

    o_ref[...] = acc.astype(o_ref.dtype)


def conv3x3_fused(x2, scale_t, shift_t, band, *, h_in, w_in, cin, cout,
                  stride, out_dtype, shortcut=None, emit_stats=False):
    n = x2.shape[0]
    ho = (h_in - 1) // stride + 1
    wo = (w_in - 1) // stride + 1
    tho = 8 if (ho % 8 == 0 and ho > 8) else ho
    assert ho % tho == 0
    nh = ho // tho
    lanes_out = wo * cout

    in_specs = [
        pl.BlockSpec((None, h_in, w_in * cin), lambda i, j: (i, 0, 0)),
        pl.BlockSpec((1, w_in * cin), lambda i, j: (0, 0)),
        pl.BlockSpec((1, w_in * cin), lambda i, j: (0, 0)),
        pl.BlockSpec((3, w_in * cin, lanes_out), lambda i, j: (0, 0, 0)),
    ]
    args = [x2, scale_t, shift_t, band]

    mode = None if shortcut is None else shortcut["mode"]
    sc_stride = 1
    if mode == "proj":
        sc_stride = shortcut["stride"]
        sx2 = shortcut["x2"]
        wc_x = sx2.shape[-1]
        rows_blk = tho * sc_stride
        in_specs += [
            pl.BlockSpec((None, rows_blk, wc_x), lambda i, j: (i, j, 0)),
            pl.BlockSpec((1, wc_x), lambda i, j: (0, 0)),
            pl.BlockSpec((1, wc_x), lambda i, j: (0, 0)),
            pl.BlockSpec((wc_x, lanes_out), lambda i, j: (0, 0)),
        ]
        args += [sx2, shortcut["scale_t"], shortcut["shift_t"], shortcut["band"]]
    elif mode == "identity":
        in_specs += [pl.BlockSpec((None, tho, lanes_out), lambda i, j: (i, j, 0))]
        args += [shortcut["x2"]]

    if emit_stats:
        out_shape = (jax.ShapeDtypeStruct((n, ho, lanes_out), out_dtype),
                     jax.ShapeDtypeStruct((n, 1, lanes_out), jnp.float32),
                     jax.ShapeDtypeStruct((n, 1, lanes_out), jnp.float32))
        out_specs = (pl.BlockSpec((None, tho, lanes_out), lambda i, j: (i, j, 0)),
                     pl.BlockSpec((None, 1, lanes_out), lambda i, j: (i, 0, 0)),
                     pl.BlockSpec((None, 1, lanes_out), lambda i, j: (i, 0, 0)))
    else:
        out_shape = jax.ShapeDtypeStruct((n, ho, lanes_out), out_dtype)
        out_specs = pl.BlockSpec((None, tho, lanes_out), lambda i, j: (i, j, 0))

    kernel = functools.partial(_conv3x3_kernel, stride=stride, tho=tho, h_in=h_in,
                               shortcut_mode=mode, sc_stride=sc_stride,
                               emit_stats=emit_stats)

    return pl.pallas_call(
        kernel,
        out_shape=out_shape,
        grid=(n, nh),
        in_specs=in_specs,
        out_specs=out_specs,
        scratch_shapes=[pltpu.VMEM((h_in + 9, w_in * cin), jnp.float32)],
        compiler_params=pltpu.CompilerParams(
            dimension_semantics=("parallel", "arbitrary"),
            vmem_limit_bytes=VMEM_LIMIT),
    )(*args)


# ---------------------------------------------------------------------------
# Module forward (glue + Pallas kernels).
# ---------------------------------------------------------------------------
def preact_block_forward(x_nchw, params, stride):
    # TODO(synk): self.index is always None in this module, so the indexed
    # shortcut-slice branch is intentionally not implemented (plain add is used).
    n, cin, h, w = x_nchw.shape
    cmid = params["conv1_w"].shape[-1]
    ho = (h - 1) // stride + 1
    wo = (w - 1) // stride + 1

    x = jnp.transpose(x_nchw, (0, 2, 3, 1))                  # glue: NCHW -> NHWC
    x2 = x.reshape(n, h, w * cin)                            # lane-flattened (free)

    # BN1 (batch stats on x) -> scale/shift, fused into conv1 and the shortcut.
    s1, b1 = bn_scale_shift(x2, w, cin, params["bn1_gamma"], params["bn1_beta"],
                            count=n * h * w)

    # Conv1 also emits the per-batch sum / sumsq of its output so BN2 statistics
    # never require a second HBM pass over c1.
    band1 = make_conv3x3_band(params["conv1_w"], w, stride)
    c1, c1_sum, c1_sq = conv3x3_fused(
        x2, s1, b1, band1, h_in=h, w_in=w, cin=cin, cout=cmid,
        stride=stride, out_dtype=x.dtype, emit_stats=True)    # (n, ho, wo*cmid)

    s2, b2 = _scale_shift_from_sums(
        c1_sum.sum(axis=(0, 1)), c1_sq.sum(axis=(0, 1)),
        wo, cmid, params["bn2_gamma"], params["bn2_beta"], count=n * ho * wo)

    band2 = make_conv3x3_band(params["conv2_w"], wo, 1)

    if "shortcut_w" in params:
        shortcut = dict(mode="proj", x2=x2, scale_t=s1, shift_t=b1,
                        band=make_conv1x1_band(params["shortcut_w"], w, stride),
                        stride=stride)
    else:
        shortcut = dict(mode="identity", x2=x2)

    out2 = conv3x3_fused(c1, s2, b2, band2, h_in=ho, w_in=wo, cin=cmid, cout=cmid,
                         stride=1, out_dtype=x.dtype, shortcut=shortcut)

    out = out2.reshape(n, ho, wo, cmid)                       # glue: un-flatten lanes
    return jnp.transpose(out, (0, 3, 1, 2))                   # glue: NHWC -> NCHW


# ---------------------------------------------------------------------------
# Pure-JAX reference for verification.
# ---------------------------------------------------------------------------
def ref_forward(x_nchw, params, stride):
    x = jnp.transpose(x_nchw, (0, 2, 3, 1)).astype(jnp.float32)

    def bnrelu(t, g, b):
        m = t.mean(axis=(0, 1, 2), keepdims=True)
        v = ((t - m) ** 2).mean(axis=(0, 1, 2), keepdims=True)
        return jnp.maximum((t - m) * jax.lax.rsqrt(v + BN_EPS) * g + b, 0.0)

    def conv(t, w, s, pad):
        return jax.lax.conv_general_dilated(
            t, w, window_strides=(s, s), padding=pad,
            dimension_numbers=("NHWC", "HWIO", "NHWC"))

    out = bnrelu(x, params["bn1_gamma"], params["bn1_beta"])
    if "shortcut_w" in params:
        wsc = params["shortcut_w"].reshape(1, 1, *params["shortcut_w"].shape)
        sc = conv(out, wsc, stride, "VALID")
    else:
        sc = x
    out = conv(out, params["conv1_w"], stride, [(1, 1), (1, 1)])
    out = bnrelu(out, params["bn2_gamma"], params["bn2_beta"])
    out = conv(out, params["conv2_w"], 1, [(1, 1), (1, 1)])
    out = out + sc
    return jnp.transpose(out, (0, 3, 1, 2))


# ---------------------------------------------------------------------------
def make_params(key, in_channels, channels, stride):
    ks = jax.random.split(key, 7)
    params = {
        "bn1_gamma": 1.0 + 0.1 * jax.random.normal(ks[0], (in_channels,), jnp.float32),
        "bn1_beta": 0.1 * jax.random.normal(ks[1], (in_channels,), jnp.float32),
        "conv1_w": 0.2 * jax.random.normal(ks[2], (3, 3, in_channels, channels), jnp.float32),
        "bn2_gamma": 1.0 + 0.1 * jax.random.normal(ks[3], (channels,), jnp.float32),
        "bn2_beta": 0.1 * jax.random.normal(ks[4], (channels,), jnp.float32),
        "conv2_w": 0.2 * jax.random.normal(ks[5], (3, 3, channels, channels), jnp.float32),
    }
    if stride != 1 or in_channels != channels:
        params["shortcut_w"] = 0.2 * jax.random.normal(ks[6], (in_channels, channels), jnp.float32)
    return params


if __name__ == "__main__":
    key = jax.random.PRNGKey(0)
    n, h, w = 2, 16, 16
    configs = [
        (4, 8, 1),   # in != channels -> 1x1 projection shortcut (fused into conv2)
        (8, 8, 1),   # in == channels, stride 1 -> identity shortcut (fused add of x)
    ]
    for i, (cin, cmid, stride) in enumerate(configs):
        kx, kp = jax.random.split(jax.random.fold_in(key, i))
        x = jax.random.normal(kx, (n, cin, h, w), jnp.float32)   # NCHW like PyTorch
        params = make_params(kp, cin, cmid, stride)

        out = jax.block_until_ready(preact_block_forward(x, params, stride))
        ref = jax.block_until_ready(ref_forward(x, params, stride))
        np.testing.assert_allclose(np.asarray(out), np.asarray(ref),
                                   rtol=2e-3, atol=2e-3)

    print("KERNEL_OK")
</pallas_src>

<mosaic_0001>
module attributes {stable_mosaic.version = 11 : i64} {
  func.func @_bn_stats_kernel(%arg0: i32, %arg1: memref<1x16x64xf32, #tpu.memory_space<vmem>>, %arg2: memref<1x64xf32, #tpu.memory_space<vmem>>, %arg3: memref<1x64xf32, #tpu.memory_space<vmem>>, %arg4: memref<1x64xf32, #tpu.memory_space<vmem>>, %arg5: memref<1x64xf32, #tpu.memory_space<vmem>>) attributes {dimension_semantics = [#tpu.dimension_semantics<arbitrary>], iteration_bounds = array<i64: 2>, scalar_prefetch = 0 : i64, scratch_operands = 2 : i64, tpu.core_type = #tpu.core_type<tc>, window_params = [{transform_indices = @transform_0, window_bounds = array<i64: 1, 16, 64>}, {pipeline_mode = #tpu.pipeline_mode<synchronous>, transform_indices = @transform_1, window_bounds = array<i64: 1, 64>}, {pipeline_mode = #tpu.pipeline_mode<synchronous>, transform_indices = @transform_2, window_bounds = array<i64: 1, 64>}]} {
    %c0_i32 = arith.constant 0 : i32
    %0 = arith.cmpi eq, %arg0, %c0_i32 : i32
    %1 = arith.extui %0 : i1 to i32
    %c0_i32_0 = arith.constant 0 : i32
    %2 = arith.cmpi ne, %1, %c0_i32_0 : i32
    scf.if %2 {
      %cst_13 = arith.constant 0.000000e+00 : f32
      %19 = vector.broadcast %cst_13 : f32 to vector<1x64xf32>
      %c0_14 = arith.constant 0 : index
      %c0_15 = arith.constant 0 : index
      %20 = vector.load %arg4[%c0_14, %c0_15] : memref<1x64xf32, #tpu.memory_space<vmem>>, vector<1x64xf32>
      tpu.vector_store %arg4[%c0_14, %c0_15], %19 {strides = array<i32>} : memref<1x64xf32, #tpu.memory_space<vmem>>, vector<1x64xf32>,
      %cst_16 = arith.constant 0.000000e+00 : f32
      %21 = vector.broadcast %cst_16 : f32 to vector<1x64xf32>
      %c0_17 = arith.constant 0 : index
      %c0_18 = arith.constant 0 : index
      %22 = vector.load %arg5[%c0_17, %c0_18] : memref<1x64xf32, #tpu.memory_space<vmem>>, vector<1x64xf32>
      tpu.vector_store %arg5[%c0_17, %c0_18], %21 {strides = array<i32>} : memref<1x64xf32, #tpu.memory_space<vmem>>, vector<1x64xf32>,
    } else {
    }
    %c0 = arith.constant 0 : index
    %c0_1 = arith.constant 0 : index
    %c0_2 = arith.constant 0 : index
    %3 = vector.load %arg1[%c0, %c0_1, %c0_2] : memref<1x16x64xf32, #tpu.memory_space<vmem>>, vector<1x16x64xf32>
    %4 = vector.shape_cast %3 : vector<1x16x64xf32> to vector<16x64xf32>
    %c0_3 = arith.constant 0 : index
    %c0_4 = arith.constant 0 : index
    %5 = vector.load %arg4[%c0_3, %c0_4] : memref<1x64xf32, #tpu.memory_space<vmem>>, vector<1x64xf32>
    %cst = arith.constant dense<0.000000e+00> : vector<64xf32>
    %6 = vector.multi_reduction <add>, %4, %cst [0] : vector<16x64xf32> to vector<64xf32>
    %7 = vector.shape_cast %6 : vector<64xf32> to vector<1x64xf32>
    %8 = arith.addf %5, %7 : vector<1x64xf32>
    %c0_5 = arith.constant 0 : index
    %c0_6 = arith.constant 0 : index
    %9 = vector.load %arg4[%c0_5, %c0_6] : memref<1x64xf32, #tpu.memory_space<vmem>>, vector<1x64xf32>
    tpu.vector_store %arg4[%c0_5, %c0_6], %8 {strides = array<i32>} : memref<1x64xf32, #tpu.memory_space<vmem>>, vector<1x64xf32>,
    %c0_7 = arith.constant 0 : index
    %c0_8 = arith.constant 0 : index
    %10 = vector.load %arg5[%c0_7, %c0_8] : memref<1x64xf32, #tpu.memory_space<vmem>>, vector<1x64xf32>
    %11 = arith.mulf %4, %4 : vector<16x64xf32>
    %cst_9 = arith.constant dense<0.000000e+00> : vector<64xf32>
    %12 = vector.multi_reduction <add>, %11, %cst_9 [0] : vector<16x64xf32> to vector<64xf32>
    %13 = vector.shape_cast %12 : vector<64xf32> to vector<1x64xf32>
    %14 = arith.addf %10, %13 : vector<1x64xf32>
    %c0_10 = arith.constant 0 : index
    %c0_11 = arith.constant 0 : index
    %15 = vector.load %arg5[%c0_10, %c0_11] : memref<1x64xf32, #tpu.memory_space<vmem>>, vector<1x64xf32>
    tpu.vector_store %arg5[%c0_10, %c0_11], %14 {strides = array<i32>} : memref<1x64xf32, #tpu.memory_space<vmem>>, vector<1x64xf32>,
    %c1_i32 = arith.constant 1 : i32
    %16 = arith.cmpi eq, %arg0, %c1_i32 : i32
    %17 = arith.extui %16 : i1 to i32
    %c0_i32_12 = arith.constant 0 : i32
    %18 = arith.cmpi ne, %17, %c0_i32_12 : i32
    scf.if %18 {
      %c0_13 = arith.constant 0 : index
      %c0_14 = arith.constant 0 : index
      %19 = vector.load %arg4[%c0_13, %c0_14] : memref<1x64xf32, #tpu.memory_space<vmem>>, vector<1x64xf32>
      %c0_15 = arith.constant 0 : index
      %c0_16 = arith.constant 0 : index
      %20 = vector.load %arg2[%c0_15, %c0_16] : memref<1x64xf32, #tpu.memory_space<vmem>>, vector<1x64xf32>
      tpu.vector_store %arg2[%c0_15, %c0_16], %19 {strides = array<i32>} : memref<1x64xf32, #tpu.memory_space<vmem>>, vector<1x64xf32>,
      %c0_17 = arith.constant 0 : index
      %c0_18 = arith.constant 0 : index
      %21 = vector.load %arg5[%c0_17, %c0_18] : memref<1x64xf32, #tpu.memory_space<vmem>>, vector<1x64xf32>
      %c0_19 = arith.constant 0 : index
      %c0_20 = arith.constant 0 : index
      %22 = vector.load %arg3[%c0_19, %c0_20] : memref<1x64xf32, #tpu.memory_space<vmem>>, vector<1x64xf32>
      tpu.vector_store %arg3[%c0_19, %c0_20], %21 {strides = array<i32>} : memref<1x64xf32, #tpu.memory_space<vmem>>, vector<1x64xf32>,
    } else {
    }
    return
  }
  func.func @transform_0(%arg0: i32) -> (i32, i32, i32) {
    %c0_i32 = arith.constant 0 : i32
    %c0_i32_0 = arith.constant 0 : i32
    %c0_i32_1 = arith.constant 0 : i32
    return %arg0, %c0_i32, %c0_i32_0 : i32, i32, i32
  }
  func.func @transform_1(%arg0: i32) -> (i32, i32) {
    %c0_i32 = arith.constant 0 : i32
    %c0_i32_0 = arith.constant 0 : i32
    %c0_i32_1 = arith.constant 0 : i32
    return %c0_i32, %c0_i32_0 : i32, i32
  }
  func.func @transform_2(%arg0: i32) -> (i32, i32) {
    %c0_i32 = arith.constant 0 : i32
    %c0_i32_0 = arith.constant 0 : i32
    %c0_i32_1 = arith.constant 0 : i32
    return %c0_i32, %c0_i32_0 : i32, i32
  }
}

</mosaic_0001>

<bundles_post_ra>
// kernel: tpu_custom_call.1
= control target key start
LH: loop header
LB: loop body
LE: loop exit
PB: predicated region body
PF: predicated region fallthrough
CT: control target
= control target key end

     0   :  { %8 = vsyncpa [#allocation5], 0  ;;  %s643_s0 = inlined_call_operand.hbm [shape: f32[2,16,64], index: 0, kind: input, shape index: {}]   ;;  %s644_s1 = inlined_call_operand.hbm [shape: f32[1,64], index: 1, kind: output, shape index: {0}]   ;;  %s645_s2 = inlined_call_operand.hbm [shape: f32[1,64], index: 2, kind: output, shape index: {1}]  }
   0x1   :  { %10 = vsyncpa [#allocation5 + $0x1], 0 }
   0x2   :  { %11 = vsyncpa [#allocation6], 0 }
   0x3   :  { %12 = vsyncpa [#allocation9], 0  ;;  %s493_s9 = smov 0   ;;  %s495_s10 = smov 0  }
   0x4   :  { %s497_s11 = smov 0   ;;  %s499_s12 = smov 0  }
   0x5 LB: > { %s512_s13 = sadd.s32 4294967295, %s470_s12   ;;  %s515_s14 = sadd.s32 1, %s470_s12   ;;  %s470_s12 = sphi %s499_s12, %s652_s12   ;;  %s466_s11 = sphi %s497_s11, %s651_s11   ;;  %s462_s10 = sphi %s495_s10, %s650_s10   ;;  %s458_s9 = sphi %s493_s9, %s649_s9  }
   0x6   : > { %s22_s15 = ssub.s32 %s470_s12, %s515_s14  ;;  %s25_s16 = sadd.s32 1, %s466_s11 }
   0x7   : > { %p23_p0 = scmp.eq.s32.totalorder %s22_s15, 0  ;;  %p32_p1 = scmp.ne.s32.totalorder %s466_s11, %s462_s10 }
   0x8   : > { %p33_p2 = scmp.eq.s32.totalorder %s470_s12, 0  ;;  %p38_p3 = scmp.ne.s32.totalorder %s462_s10, %s458_s9 }
   0x9   : > { %s525_s17 = scalar_select %p23_p0, %s466_s11, %s25_s16  }
   0xa   : > { %p34_p4 = por %p33_p2, %p32_p1  ;;  %p39_p5 = scmp.eq.s32.totalorder %s512_s13, 0 }
   0xb   : > { %p304_p6 = scmp.lt.s32.totalorder %s470_s12, 2  ;;  %s104_s19 = sand.u32 1, %s466_s11  }
   0xc   : > { %p529_p7 = por %p39_p5, %p38_p3  ;;  %s276_s20 = sshll.u32 %s104_s19, 4 }
   0xd   : > { %s289_s21 = sshll.u32 %s470_s12, 8  ;;  %s108_s25 = scalar_lea.vmem [#allocation4], %s276_s20 }
   0xe   : > { %s538_s24 = scalar_lea.hbm %s643_s0, %s289_s21  ;;  %s115_s26 = sshll.u32 %s108_s25, 4  ;;  %s540_s26 = int_to_ptr.vmem [resolvable:$true] %s115_s26 }
   0xf   : > { %p542_p8 = pnand %p304_p6, %p34_p4  ;;  %s547_s28 = scalar_lea.sflag [#allocation5], %s104_s19 }
  0x10   : > { %s346_s29 = scalar_lea.hbm %s538_s24, 256  ;;  %s351_s4 = scalar_lea.hbm %s643_s0, 512 }
  0x11   : > { %p347_p10 = scmp.ne.s32.totalorder %s538_s24, %s346_s29  ;;  %p348_p11 = pneg %p542_p8 }
  0x12   : > { %p352_p0 = scmp.lt.u32.totalorder %s538_s24, %s643_s0  ;;  %p353_p1 = scmp.lt.u32.totalorder %s351_s4, %s346_s29 }
  0x13   : > { %p349_p12 = pnand %p348_p11, %p347_p10  ;;  %p355_p3 = scmp.lt.u32.totalorder %s346_s29, %s538_s24 }
  0x14   : > { %p354_p2 = por %p353_p1, %p352_p0 }
  0x15   : > { %p350_p13 = pneg %p349_p12 }
  0x16   : > { %p356_p4 = por %p355_p3, %p354_p2 }
  0x18   : > { %p357_p5 = pnand %p356_p4, %p350_p13 }
  0x1a   : > { %360 = shalt.err (!%p357_p5)
}
  0x1b   : > { %s361_s7 = scalar_lea.vmem %s540_s26, 256  ;;  %s472_s8 = smov [#allocation4]  }
  0x1c   : > { %p362_p6 = scmp.ne.s32.totalorder %s540_s26, %s361_s7  ;;  %s366_s9 = sshll.u32 %s472_s8, 4  ;;  %s367_s9 = int_to_ptr.vmem [resolvable:$false] %s366_s9 }
  0x1d   : > { %s368_s15 = scalar_lea.vmem %s367_s9, 512  ;;  %p369_p9 = scmp.lt.s32.totalorder %s540_s26, %s367_s9 }
  0x1e   : > { %p364_p10 = pnand %p362_p6, %p348_p11  ;;  %p370_p0 = scmp.lt.s32.totalorder %s368_s15, %s361_s7 }
  0x20   : > { %p365_p12 = pneg %p364_p10  ;;  %p371_p1 = por %p370_p0, %p369_p9 }
  0x22   : > { %p372_p2 = pnand %p371_p1, %p365_p12 }
  0x24   : > { %375 = shalt.err (!%p372_p2)
}
  0x25   : > { %s473_s16 = smov 128   ;;  %s474_s19 = smov 8  }
  0x26   : > { %303 = dma.hbm_to_vmem [thread:$0]  (!%p542_p8), %s538_s24, 256, %s540_s26, %s547_s28, %s473_s16, %s473_s16, %s474_s19  }
  0x27   : > { %p123_p11 = scmp.lt.s32.totalorder %s470_s12, 3  ;;  %p648_p13 = scmp.ge.s32.totalorder %s470_s12, 1 }
  0x29   : > { %p124_p3 = pnand %p648_p13, %p123_p11 }
  0x2a   : > { %s129_s20 = sand.u32 (!%p124_p3), 1, %s462_s10  }
  0x2b   : > { %127 = sbr.rel (%p124_p3) target bundleno = 137 (0x89), region = 24  ;;  %s280_s21 = sshll.u32 (!%p124_p3), %s129_s20, 4 }
  0x2c   : > { %s130_s22 = scalar_lea.sflag (!%p124_p3), [#allocation5], %s129_s20  ;;  %s133_s23 = scalar_lea.vmem (!%p124_p3), [#allocation4], %s280_s21 }
  0x32   : > { %445 = dma.done.wait (%p529_p7), %s130_s22, 256  }
  0x33   : > { %447 = vsyncadd (%p529_p7), %s130_s22, 4294967040  ;;  %p281_p9 = scmp.ne.s32.totalorder %s512_s13, 0 }
  0x34   : > { %vm153_vm0 = vcmask (!%p281_p9), 516096   ;;  %v475_v0 = vmov (!%p281_p9), 0.0  }
  0x35   : > { %152 = sbr.rel (%p281_p9) target bundleno = 60 (0x3c), region = 32  ;;  %154 = vst.msk [vmem:[#allocation2] sm:$0x1] (!%p281_p9), %vm153_vm0, %v475_v0  ;;  %155 = vst.msk [vmem:[#allocation3] sm:$0x1] (!%p281_p9), %vm153_vm0, %v475_v0 }
  0x3c PF: > { %v156_v1 = vld [vmem:[%s133_s23] sm:$0xff]  ;;  %v157_v2 = vld [vmem:[%s133_s23 + $0x8] sm:$0xff]  ;;  %vm159_vm1 = vcmask 523264   ;;  %vm170_vm2 = vcmask 516096   ;;  %p282_p7 = scmp.ne.s32.totalorder %s512_s13, 1 }
  0x3d   : > { %v160_v3 = vsel %vm159_vm1, %v156_v1, 0.0  ;;  %v161_v4 = vsel %vm159_vm1, %v157_v2, 0.0  ;;  %v173_v5 = vmul.f32 %v156_v1, %v156_v1  ;;  %v174_v6 = vmul.f32 %v157_v2, %v157_v2  ;;  %v158_v20 = vld [vmem:[#allocation2] sm:$0x1]  ;;  %v172_v23 = vld [vmem:[#allocation3] sm:$0x1] }
  0x3e   : > { %v162_v7 = vadd.f32 %v161_v4, %v160_v3 }
  0x3f   : > { %v175_v8 = vsel %vm159_vm1, %v173_v5, 0.0  ;;  %v176_v9 = vsel %vm159_vm1, %v174_v6, 0.0 }
  0x40   : > { %v163_v10 = vrot.slane %v162_v7, 4  ;;  %v177_v11 = vadd.f32 %v176_v9, %v175_v8 }
  0x42   : > { %v164_v12 = vadd.f32 %v163_v10, %v162_v7  ;;  %v178_v13 = vrot.slane %v177_v11, 4 }
  0x44   : > { %v165_v14 = vrot.slane %v164_v12, 2  ;;  %v179_v15 = vadd.f32 %v178_v13, %v177_v11 }
  0x46   : > { %v166_v16 = vadd.f32 %v165_v14, %v164_v12  ;;  %v180_v17 = vrot.slane %v179_v15, 2 }
  0x48   : > { %v167_v18 = vrot.slane %v166_v16, 1  ;;  %v181_v19 = vadd.f32 %v180_v17, %v179_v15 }
  0x4a   : > { %v168_v21 = vadd.f32 %v167_v18, %v166_v16  ;;  %v182_v22 = vrot.slane %v181_v19, 1  ;;  %189 = sbr.rel (%p282_p7) target bundleno = 89 (0x59), region = 36 }
  0x4c   : > { %v169_v24 = vadd.f32 %v168_v21, %v158_v20  ;;  %v183_v25 = vadd.f32 %v182_v22, %v181_v19 }
  0x4e   : > { %171 = vst.msk [vmem:[#allocation2] sm:$0x1] %vm170_vm2, %v169_v24  ;;  %v184_v26 = vadd.f32 %v183_v25, %v172_v23 }
  0x50   : > { %185 = vst.msk [vmem:[#allocation3] sm:$0x1] %vm170_vm2, %v184_v26 }
  0x55   : > { %v190_v27 = vld [vmem:[#allocation2] sm:$0x1] }
  0x56   : > { %191 = vst.msk [vmem:[#allocation7] sm:$0x1] %vm170_vm2, %v190_v27 }
  0x57   : > { %v192_v28 = vld [vmem:[#allocation3] sm:$0x1] }
  0x58   : > { %193 = vst.msk [vmem:[#allocation8] sm:$0x1] %vm170_vm2, %v192_v28 }
  0x59 PF: > { %p305_p8 = scmp.eq.s32.totalorder %s512_s13, 1  ;;  %s476_s12 = smov [#allocation7]  }
  0x5a   : > { %s201_s18 = sshll.u32 %s476_s12, 4  ;;  %s477_s24 = smov [#allocation8]   ;;  %s202_s18 = int_to_ptr.vmem [resolvable:$true] %s201_s18 }
  0x5b   : > { %s212_s25 = sshll.u32 %s477_s24, 4  ;;  %s376_s26 = scalar_lea.vmem %s202_s18, 16  ;;  %s213_s25 = int_to_ptr.vmem [resolvable:$true] %s212_s25 }
  0x5c   : > { %p377_p4 = scmp.ne.s32.totalorder %s202_s18, %s376_s26  ;;  %s382_s27 = scalar_lea.vmem %s202_s18, 32 }
  0x5d   : > { %p383_p10 = scmp.lt.s32.totalorder %s202_s18, %s202_s18  ;;  %p384_p12 = scmp.lt.s32.totalorder %s382_s27, %s376_s26 }
  0x5e   : > { %p378_p5 = pnand %p377_p4, %p305_p8 }
  0x5f   : > { %p385_p0 = por %p384_p12, %p383_p10 }
  0x60   : > { %p379_p6 = pneg %p378_p5 }
  0x62   : > { %p386_p1 = pnand %p385_p0, %p379_p6 }
  0x64   : > { %389 = shalt.err (!%p386_p1)
}
  0x65   : > { %s390_s30 = scalar_lea.hbm %s644_s1, 16 }
  0x66   : > { %p391_p2 = scmp.ne.s32.totalorder %s644_s1, %s390_s30  ;;  %p396_p3 = scmp.lt.u32.totalorder %s390_s30, %s644_s1 }
  0x68   : > { %p392_p11 = pnand %p391_p2, %p305_p8 }
  0x6a   : > { %p393_p13 = pneg %p392_p11 }
  0x6c   : > { %p398_p9 = pnand %p396_p3, %p393_p13 }
  0x6e   : > { %401 = shalt.err (!%p398_p9)
}
  0x6f   : > { %293 = dma.vmem_to_hbm [thread:$0]  (%p305_p8), %s202_s18, 16, %s644_s1, [#allocation6]  }
  0x70   : > { %s402_s9 = scalar_lea.vmem %s213_s25, 16  ;;  %s408_s15 = scalar_lea.vmem %s213_s25, 32 }
  0x71   : > { %p403_p7 = scmp.ne.s32.totalorder %s213_s25, %s402_s9  ;;  %p409_p6 = scmp.lt.s32.totalorder %s213_s25, %s213_s25 }
  0x72   : > { %p410_p10 = scmp.lt.s32.totalorder %s408_s15, %s402_s9 }
  0x73   : > { %p404_p4 = pnand %p403_p7, %p305_p8 }
  0x74   : > { %p411_p12 = por %p410_p10, %p409_p6 }
  0x75   : > { %p405_p5 = pneg %p404_p4 }
  0x77   : > { %p412_p0 = pnand %p411_p12, %p405_p5 }
  0x79   : > { %415 = shalt.err (!%p412_p0)
}
  0x7a   : > { %s416_s20 = scalar_lea.hbm %s645_s2, 16 }
  0x7b   : > { %p417_p1 = scmp.ne.s32.totalorder %s645_s2, %s416_s20  ;;  %p422_p13 = scmp.lt.u32.totalorder %s416_s20, %s645_s2 }
  0x7d   : > { %p418_p2 = pnand %p417_p1, %p305_p8 }
  0x7f   : > { %p419_p11 = pneg %p418_p2 }
  0x81   : > { %p424_p3 = pnand %p422_p13, %p419_p11 }
  0x83   : > { %427 = shalt.err (!%p424_p3)
}
  0x84   : > { %295 = dma.vmem_to_hbm [thread:$0]  (%p305_p8), %s213_s25, 16, %s645_s2, [#allocation9]  }
  0x85   : > { %449 = dma.done.wait (%p305_p8), [#allocation6], 16  }
  0x86   : > { %451 = vsyncadd (%p305_p8), [#allocation6], 4294967280 }
  0x87   : > { %453 = dma.done.wait (%p305_p8), [#allocation9], 16  }
  0x88   : > { %455 = vsyncadd (%p305_p8), [#allocation9], 4294967280 }
  0x89 PF: > { %p15_p9 = scmp.ge.s32.totalorder %s515_s14, 4   ;;  %s649_s9 = smov %s462_s10 }
  0x8a   : > { %s650_s10 = smov %s466_s11  ;;  %s651_s11 = smov %s525_s17 }
  0x8b   : > { %s652_s12 = smov %s515_s14  ;;  %17 = sbr.rel (!%p15_p9) target bundleno = 5 (0x5), region = 77 }
  0x92   :  { %229 = vsyncpa [#allocation5], 1 }
  0x93   :  { %231 = vsyncpa [#allocation5 + $0x1], 1 }
  0x94   :  { %232 = vsyncpa [#allocation6], 1 }
  0x95   :  { %234 = vsyncpa [#allocation6 + $0x1], 1 }
  0x96   :  { %235 = vsyncpa [#allocation9], 1 }

</bundles_post_ra>
